<compile_context>
chip_gen: v5e
topology: v5e:2x2
jax: 0.10.0
libtpu: 0.0.40
codegen_flags: <defaults>
</compile_context>

<pallas_src>
import jax
import jax.numpy as jnp
from jax.experimental import pallas as pl
from jax.experimental.pallas import tpu as pltpu

EPS = 1e-5


# --------------------------------- kernel ------------------------------------
def _make_double_conv_kernel(N, H, W, Cout):
    rows = N * H

    def _stage(x, wmat_ref, gamma_ref, beta_ref, fold_ref, spread_ref,
               mask_top, mask_bot):
        # x: (rows, W*Cprev) f32 lane-dense slab (a value, already in vregs).
        # wmat_ref: (3, W*Cprev, W*Cout) row-Toeplitz conv weights (dy taps).

        # ---- 3x3 conv as 3 MXU matmuls (one per vertical tap) ----------
        # dy=1 (center tap) initializes the accumulator directly.
        acc = jnp.dot(x, wmat_ref[1], preferred_element_type=jnp.float32)
        # dy=0: neighbor row ABOVE.  Roll rows down by 1 (XLU) and zero the
        # h==0 rows (SAME top padding; also kills cross-image wraparound).
        acc += jnp.dot(mask_top * pltpu.roll(x, shift=1, axis=0),
                       wmat_ref[0], preferred_element_type=jnp.float32)
        # dy=2: neighbor row BELOW.  Roll rows up by 1 (shift = rows-1) and
        # zero the h==H-1 rows (SAME bottom padding + wraparound).
        acc += jnp.dot(mask_bot * pltpu.roll(x, shift=rows - 1, axis=0),
                       wmat_ref[2], preferred_element_type=jnp.float32)

        # ---- one-pass BatchNorm (training-mode stats) + ReLU -----------
        inv_cnt = jnp.float32(1.0 / (rows * W))
        stats = jnp.concatenate(
            [jnp.sum(acc, axis=0, keepdims=True),
             jnp.sum(acc * acc, axis=0, keepdims=True)], axis=0)  # (2, W*Cout)
        # One dot folds the (w, c) lane layout down to per-channel stats.
        stats_c = jnp.dot(stats, fold_ref[...],
                          preferred_element_type=jnp.float32) * inv_cnt  # (2, Cout)
        mean, ex2 = stats_c[0:1], stats_c[1:2]
        var = jnp.maximum(ex2 - mean * mean, 0.0)   # clamp: one-pass var >= 0
        scale = gamma_ref[...] * jax.lax.rsqrt(var + EPS)       # (1, Cout)
        shift = beta_ref[...] - mean * scale                    # (1, Cout)
        # One dot spreads per-channel scale/shift back onto the (w, c) lanes.
        ss = jnp.dot(jnp.concatenate([scale, shift], axis=0), spread_ref[...],
                     preferred_element_type=jnp.float32)        # (2, W*Cout)
        return jnp.maximum(acc * ss[0:1] + ss[1:2], 0.0)        # (rows, W*Cout)

    def kernel(x_ref, w1_ref, g1_ref, beta1_ref, w2_ref, g2_ref, beta2_ref,
               fold_ref, spread_ref, o_ref):
        # Static 0/1 row masks for the vertical taps, built once per call.
        h_idx = jax.lax.broadcasted_iota(jnp.int32, (rows, 1), 0) % H
        mask_top = (h_idx > 0).astype(jnp.float32)       # zero where h == 0
        mask_bot = (h_idx < H - 1).astype(jnp.float32)   # zero where h == H-1

        x = x_ref[...].astype(jnp.float32)               # (rows, W*Cin_pad)
        y1 = _stage(x, w1_ref, g1_ref, beta1_ref, fold_ref, spread_ref,
                    mask_top, mask_bot)
        # Stage-2 input never leaves vregs/VMEM (no HBM round-trip).
        y2 = _stage(y1, w2_ref, g2_ref, beta2_ref, fold_ref, spread_ref,
                    mask_top, mask_bot)
        o_ref[...] = y2.astype(o_ref.dtype)              # (N*H, W*Cout) lane-dense

    return kernel


# -------------------------------- wrapper -------------------------------------
def _conv_to_row_toeplitz(w_hwio, W):
    """(3,3,Cin,Cout) HWIO -> (3, W*Cin, W*Cout) block-banded matrices (one per
    vertical tap dy).  SAME zero-padding along W is realized by the band edges."""
    mats = []
    for dy in range(3):
        m = sum(jnp.kron(jnp.eye(W, k=1 - dx, dtype=w_hwio.dtype), w_hwio[dy, dx])
                for dx in range(3))
        mats.append(m)
    return jnp.stack(mats)


def double_conv(x_nchw, params):
    """DoubleConv.forward: NCHW in, NCHW out (single fused Pallas kernel)."""
    N, Cin, H, W = x_nchw.shape
    Cout = params["w1"].shape[-1]

    # Zero-pad Cin so the stage-1 slab last dim is a multiple of 128 lanes
    # (4 -> 8 here gives W*Cin_pad = 128: full-lane loads, one MXU K pass).
    Cin_pad = Cin
    if (W * Cin) % 128 != 0 and 128 % W == 0:
        Cin_pad = (-(-(W * Cin) // 128) * 128) // W

    x_nhwc = jnp.transpose(x_nchw, (0, 2, 3, 1))
    w1 = params["w1"]
    if Cin_pad != Cin:
        x_nhwc = jnp.pad(x_nhwc, ((0, 0), (0, 0), (0, 0), (0, Cin_pad - Cin)))
        w1 = jnp.pad(w1, ((0, 0), (0, 0), (0, Cin_pad - Cin), (0, 0)))
    x_slab = x_nhwc.reshape(N * H, W * Cin_pad)

    w1m = _conv_to_row_toeplitz(w1, W)                  # (3, W*Cin_pad, W*Cout)
    w2m = _conv_to_row_toeplitz(params["w2"], W)        # (3, W*Cout,    W*Cout)
    fold = jnp.tile(jnp.eye(Cout, dtype=jnp.float32), (W, 1))  # (W*Cout, Cout)
    spread = fold.T                                             # (Cout, W*Cout)

    vmem = pl.BlockSpec(memory_space=pltpu.MemorySpace.VMEM)
    out_slab = pl.pallas_call(
        _make_double_conv_kernel(N, H, W, Cout),
        out_shape=jax.ShapeDtypeStruct((N * H, W * Cout), x_nchw.dtype),
        in_specs=[vmem] * 9,
        out_specs=vmem,
    )(
        x_slab, w1m,
        params["g1"].reshape(1, Cout), params["beta1"].reshape(1, Cout),
        w2m,
        params["g2"].reshape(1, Cout), params["beta2"].reshape(1, Cout),
        fold, spread,
    )
    return jnp.transpose(out_slab.reshape(N, H, W, Cout), (0, 3, 1, 2))


# ----------------------------- pure-JAX reference -----------------------------
def _ref_stage(x_nhwc, w_hwio, bias, gamma, beta):
    y = jax.lax.conv_general_dilated(
        x_nhwc, w_hwio, window_strides=(1, 1), padding="SAME",
        dimension_numbers=("NHWC", "HWIO", "NHWC"),
    ) + bias
    mean = jnp.mean(y, axis=(0, 1, 2), keepdims=True)
    var = jnp.mean(jnp.square(y - mean), axis=(0, 1, 2), keepdims=True)
    y = (y - mean) * jax.lax.rsqrt(var + EPS) * gamma + beta
    return jnp.maximum(y, 0.0)


def double_conv_ref(x_nchw, p):
    x = jnp.transpose(x_nchw, (0, 2, 3, 1))
    x = _ref_stage(x, p["w1"], p["b1"], p["g1"], p["beta1"])
    x = _ref_stage(x, p["w2"], p["b2"], p["g2"], p["beta2"])
    return jnp.transpose(x, (0, 3, 1, 2))


# ------------------------------------ main ------------------------------------
if __name__ == "__main__":
    N, C_in, C_out, H, W = 2, 4, 8, 16, 16

    key = jax.random.PRNGKey(0)
    kx, kw1, kb1, kw2, kb2, kg1, kbt1, kg2, kbt2 = jax.random.split(key, 9)

    # Deterministic synthetic parameters (shapes from nn.Conv2d / nn.BatchNorm2d).
    # Conv biases b1/b2 are used only by the reference: under training-mode BN
    # they cancel exactly, so the kernel omits them.
    params = {
        "w1": 0.1 * jax.random.normal(kw1, (3, 3, C_in, C_out), jnp.float32),
        "b1": 0.1 * jax.random.normal(kb1, (C_out,), jnp.float32),
        "g1": 1.0 + 0.1 * jax.random.normal(kg1, (C_out,), jnp.float32),
        "beta1": 0.1 * jax.random.normal(kbt1, (C_out,), jnp.float32),
        "w2": 0.1 * jax.random.normal(kw2, (3, 3, C_out, C_out), jnp.float32),
        "b2": 0.1 * jax.random.normal(kb2, (C_out,), jnp.float32),
        "g2": 1.0 + 0.1 * jax.random.normal(kg2, (C_out,), jnp.float32),
        "beta2": 0.1 * jax.random.normal(kbt2, (C_out,), jnp.float32),
    }

    x = jax.random.normal(kx, (N, C_in, H, W), jnp.float32)  # NCHW like PyTorch

    out = jax.block_until_ready(double_conv(x, params))
    ref = jax.block_until_ready(double_conv_ref(x, params))

    assert out.shape == (N, C_out, H, W)
    assert jnp.allclose(out, ref, rtol=1e-4, atol=1e-4), "mismatch vs JAX reference"

    print("KERNEL_OK")
</pallas_src>

<mosaic_0001>
module attributes {stable_mosaic.version = 11 : i64} {
  func.func @kernel(%arg0: memref<32x128xf32, #tpu.memory_space<vmem>>, %arg1: memref<3x128x128xf32, #tpu.memory_space<vmem>>, %arg2: memref<1x8xf32, #tpu.memory_space<vmem>>, %arg3: memref<1x8xf32, #tpu.memory_space<vmem>>, %arg4: memref<3x128x128xf32, #tpu.memory_space<vmem>>, %arg5: memref<1x8xf32, #tpu.memory_space<vmem>>, %arg6: memref<1x8xf32, #tpu.memory_space<vmem>>, %arg7: memref<128x8xf32, #tpu.memory_space<vmem>>, %arg8: memref<8x128xf32, #tpu.memory_space<vmem>>, %arg9: memref<32x128xf32, #tpu.memory_space<vmem>>) attributes {dimension_semantics = [], scalar_prefetch = 0 : i64, scratch_operands = 0 : i64, tpu.core_type = #tpu.core_type<tc>} {
    %0 = tpu.iota {dimensions = array<i32: 0>} : vector<32x1xi32>
    %c16_i32 = arith.constant 16 : i32
    %c0_i32 = arith.constant 0 : i32
    %1 = arith.cmpi eq, %c16_i32, %c0_i32 : i32
    %c1_i32 = arith.constant 1 : i32
    %2 = arith.select %1, %c1_i32, %c16_i32 : i32
    %3 = vector.broadcast %2 : i32 to vector<32x1xi32>
    %4 = arith.remsi %0, %3 : vector<32x1xi32>
    %c0_i32_0 = arith.constant 0 : i32
    %5 = vector.broadcast %c0_i32_0 : i32 to vector<32x1xi32>
    %6 = arith.cmpi ne, %4, %5 : vector<32x1xi32>
    %c0_i32_1 = arith.constant 0 : i32
    %7 = vector.broadcast %c0_i32_1 : i32 to vector<32x1xi32>
    %8 = arith.cmpi slt, %4, %7 : vector<32x1xi32>
    %c0_i32_2 = arith.constant 0 : i32
    %9 = arith.cmpi slt, %2, %c0_i32_2 : i32
    %10 = vector.broadcast %9 : i1 to vector<32x1xi1>
    %11 = vector.broadcast %10 : vector<32x1xi1> to vector<32x1xi1>
    %12 = arith.xori %8, %11 : vector<32x1xi1>
    %13 = arith.andi %12, %6 : vector<32x1xi1>
    %14 = vector.broadcast %2 : i32 to vector<32x1xi32>
    %15 = arith.addi %4, %14 : vector<32x1xi32>
    %16 = arith.select %13, %15, %4 : vector<32x1xi1>, vector<32x1xi32>
    %c0_i32_3 = arith.constant 0 : i32
    %17 = vector.broadcast %c0_i32_3 : i32 to vector<32x1xi32>
    %18 = arith.cmpi sgt, %16, %17 : vector<32x1xi32>
    %19 = arith.extui %18 : vector<32x1xi1> to vector<32x1xi32>
    %20 = arith.sitofp %19 : vector<32x1xi32> to vector<32x1xf32>
    %c15_i32 = arith.constant 15 : i32
    %21 = vector.broadcast %c15_i32 : i32 to vector<32x1xi32>
    %22 = arith.cmpi slt, %16, %21 : vector<32x1xi32>
    %23 = arith.extui %22 : vector<32x1xi1> to vector<32x1xi32>
    %24 = arith.sitofp %23 : vector<32x1xi32> to vector<32x1xf32>
    %c0 = arith.constant 0 : index
    %c0_4 = arith.constant 0 : index
    %25 = vector.load %arg0[%c0, %c0_4] : memref<32x128xf32, #tpu.memory_space<vmem>>, vector<32x128xf32>
    %c1 = arith.constant 1 : index
    %c0_5 = arith.constant 0 : index
    %c0_6 = arith.constant 0 : index
    %26 = vector.load %arg1[%c1, %c0_5, %c0_6] : memref<3x128x128xf32, #tpu.memory_space<vmem>>, vector<1x128x128xf32>
    %27 = vector.shape_cast %26 : vector<1x128x128xf32> to vector<128x128xf32>
    %cst = arith.constant dense<0.000000e+00> : vector<32x128xf32>
    %28 = tpu.matmul %25, %27, %cst {dimension_numbers = #tpu.dot_dimension_numbers<[1], [0], [0], [1], [0, 0, 1, 1], [], []>} : vector<32x128xf32>, vector<128x128xf32>, vector<32x128xf32> -> vector<32x128xf32>
    %c1_i32_7 = arith.constant 1 : i32
    %29 = tpu.dynamic_rotate %25 by %c1_i32_7 dim 0 : vector<32x128xf32>, i32 -> vector<32x128xf32>
    %30 = vector.broadcast %20 : vector<32x1xf32> to vector<32x128xf32>
    %31 = arith.mulf %30, %29 : vector<32x128xf32>
    %c0_8 = arith.constant 0 : index
    %c0_9 = arith.constant 0 : index
    %c0_10 = arith.constant 0 : index
    %32 = vector.load %arg1[%c0_8, %c0_9, %c0_10] : memref<3x128x128xf32, #tpu.memory_space<vmem>>, vector<1x128x128xf32>
    %33 = vector.shape_cast %32 : vector<1x128x128xf32> to vector<128x128xf32>
    %cst_11 = arith.constant dense<0.000000e+00> : vector<32x128xf32>
    %34 = tpu.matmul %31, %33, %cst_11 {dimension_numbers = #tpu.dot_dimension_numbers<[1], [0], [0], [1], [0, 0, 1, 1], [], []>} : vector<32x128xf32>, vector<128x128xf32>, vector<32x128xf32> -> vector<32x128xf32>
    %35 = arith.addf %28, %34 : vector<32x128xf32>
    %c31_i32 = arith.constant 31 : i32
    %36 = tpu.dynamic_rotate %25 by %c31_i32 dim 0 : vector<32x128xf32>, i32 -> vector<32x128xf32>
    %37 = vector.broadcast %24 : vector<32x1xf32> to vector<32x128xf32>
    %38 = arith.mulf %37, %36 : vector<32x128xf32>
    %c2 = arith.constant 2 : index
    %c0_12 = arith.constant 0 : index
    %c0_13 = arith.constant 0 : index
    %39 = vector.load %arg1[%c2, %c0_12, %c0_13] : memref<3x128x128xf32, #tpu.memory_space<vmem>>, vector<1x128x128xf32>
    %40 = vector.shape_cast %39 : vector<1x128x128xf32> to vector<128x128xf32>
    %cst_14 = arith.constant dense<0.000000e+00> : vector<32x128xf32>
    %41 = tpu.matmul %38, %40, %cst_14 {dimension_numbers = #tpu.dot_dimension_numbers<[1], [0], [0], [1], [0, 0, 1, 1], [], []>} : vector<32x128xf32>, vector<128x128xf32>, vector<32x128xf32> -> vector<32x128xf32>
    %42 = arith.addf %35, %41 : vector<32x128xf32>
    %cst_15 = arith.constant dense<0.000000e+00> : vector<128xf32>
    %43 = vector.multi_reduction <add>, %42, %cst_15 [0] : vector<32x128xf32> to vector<128xf32>
    %44 = vector.shape_cast %43 : vector<128xf32> to vector<1x128xf32>
    %45 = arith.mulf %42, %42 : vector<32x128xf32>
    %cst_16 = arith.constant dense<0.000000e+00> : vector<128xf32>
    %46 = vector.multi_reduction <add>, %45, %cst_16 [0] : vector<32x128xf32> to vector<128xf32>
    %47 = vector.shape_cast %46 : vector<128xf32> to vector<1x128xf32>
    %48 = tpu.concatenate %44, %47 in 0 : vector<1x128xf32>, vector<1x128xf32> -> vector<2x128xf32>
    %c0_17 = arith.constant 0 : index
    %c0_18 = arith.constant 0 : index
    %49 = vector.load %arg7[%c0_17, %c0_18] : memref<128x8xf32, #tpu.memory_space<vmem>>, vector<128x8xf32>
    %cst_19 = arith.constant dense<0.000000e+00> : vector<2x8xf32>
    %50 = tpu.matmul %48, %49, %cst_19 {dimension_numbers = #tpu.dot_dimension_numbers<[1], [0], [0], [1], [0, 0, 1, 1], [], []>} : vector<2x128xf32>, vector<128x8xf32>, vector<2x8xf32> -> vector<2x8xf32>
    %cst_20 = arith.constant 0.001953125 : f32
    %51 = vector.broadcast %cst_20 : f32 to vector<2x8xf32>
    %52 = arith.mulf %50, %51 : vector<2x8xf32>
    %53 = vector.extract_strided_slice %52 {offsets = [0, 0], sizes = [1, 8], strides = [1, 1]} : vector<2x8xf32> to vector<1x8xf32>
    %54 = vector.extract_strided_slice %52 {offsets = [1, 0], sizes = [1, 8], strides = [1, 1]} : vector<2x8xf32> to vector<1x8xf32>
    %55 = arith.mulf %53, %53 : vector<1x8xf32>
    %56 = arith.subf %54, %55 : vector<1x8xf32>
    %cst_21 = arith.constant 0.000000e+00 : f32
    %57 = vector.broadcast %cst_21 : f32 to vector<1x8xf32>
    %58 = arith.maximumf %56, %57 : vector<1x8xf32>
    %c0_22 = arith.constant 0 : index
    %c0_23 = arith.constant 0 : index
    %59 = vector.load %arg2[%c0_22, %c0_23] : memref<1x8xf32, #tpu.memory_space<vmem>>, vector<1x8xf32>
    %cst_24 = arith.constant 9.99999974E-6 : f32
    %60 = vector.broadcast %cst_24 : f32 to vector<1x8xf32>
    %61 = arith.addf %58, %60 : vector<1x8xf32>
    %62 = math.rsqrt %61 : vector<1x8xf32>
    %63 = arith.mulf %59, %62 : vector<1x8xf32>
    %c0_25 = arith.constant 0 : index
    %c0_26 = arith.constant 0 : index
    %64 = vector.load %arg3[%c0_25, %c0_26] : memref<1x8xf32, #tpu.memory_space<vmem>>, vector<1x8xf32>
    %65 = arith.mulf %53, %63 : vector<1x8xf32>
    %66 = arith.subf %64, %65 : vector<1x8xf32>
    %67 = tpu.concatenate %63, %66 in 0 : vector<1x8xf32>, vector<1x8xf32> -> vector<2x8xf32>
    %c0_27 = arith.constant 0 : index
    %c0_28 = arith.constant 0 : index
    %68 = vector.load %arg8[%c0_27, %c0_28] : memref<8x128xf32, #tpu.memory_space<vmem>>, vector<8x128xf32>
    %cst_29 = arith.constant dense<0.000000e+00> : vector<2x128xf32>
    %69 = tpu.matmul %67, %68, %cst_29 {dimension_numbers = #tpu.dot_dimension_numbers<[1], [0], [0], [1], [0, 0, 1, 1], [], []>} : vector<2x8xf32>, vector<8x128xf32>, vector<2x128xf32> -> vector<2x128xf32>
    %70 = vector.extract_strided_slice %69 {offsets = [0, 0], sizes = [1, 128], strides = [1, 1]} : vector<2x128xf32> to vector<1x128xf32>
    %71 = vector.broadcast %70 : vector<1x128xf32> to vector<32x128xf32>
    %72 = arith.mulf %42, %71 : vector<32x128xf32>
    %73 = vector.extract_strided_slice %69 {offsets = [1, 0], sizes = [1, 128], strides = [1, 1]} : vector<2x128xf32> to vector<1x128xf32>
    %74 = vector.broadcast %73 : vector<1x128xf32> to vector<32x128xf32>
    %75 = arith.addf %72, %74 : vector<32x128xf32>
    %cst_30 = arith.constant 0.000000e+00 : f32
    %76 = vector.broadcast %cst_30 : f32 to vector<32x128xf32>
    %77 = arith.maximumf %75, %76 : vector<32x128xf32>
    %c1_31 = arith.constant 1 : index
    %c0_32 = arith.constant 0 : index
    %c0_33 = arith.constant 0 : index
    %78 = vector.load %arg4[%c1_31, %c0_32, %c0_33] : memref<3x128x128xf32, #tpu.memory_space<vmem>>, vector<1x128x128xf32>
    %79 = vector.shape_cast %78 : vector<1x128x128xf32> to vector<128x128xf32>
    %cst_34 = arith.constant dense<0.000000e+00> : vector<32x128xf32>
    %80 = tpu.matmul %77, %79, %cst_34 {dimension_numbers = #tpu.dot_dimension_numbers<[1], [0], [0], [1], [0, 0, 1, 1], [], []>} : vector<32x128xf32>, vector<128x128xf32>, vector<32x128xf32> -> vector<32x128xf32>
    %c1_i32_35 = arith.constant 1 : i32
    %81 = tpu.dynamic_rotate %77 by %c1_i32_35 dim 0 : vector<32x128xf32>, i32 -> vector<32x128xf32>
    %82 = vector.broadcast %20 : vector<32x1xf32> to vector<32x128xf32>
    %83 = arith.mulf %82, %81 : vector<32x128xf32>
    %c0_36 = arith.constant 0 : index
    %c0_37 = arith.constant 0 : index
    %c0_38 = arith.constant 0 : index
    %84 = vector.load %arg4[%c0_36, %c0_37, %c0_38] : memref<3x128x128xf32, #tpu.memory_space<vmem>>, vector<1x128x128xf32>
    %85 = vector.shape_cast %84 : vector<1x128x128xf32> to vector<128x128xf32>
    %cst_39 = arith.constant dense<0.000000e+00> : vector<32x128xf32>
    %86 = tpu.matmul %83, %85, %cst_39 {dimension_numbers = #tpu.dot_dimension_numbers<[1], [0], [0], [1], [0, 0, 1, 1], [], []>} : vector<32x128xf32>, vector<128x128xf32>, vector<32x128xf32> -> vector<32x128xf32>
    %87 = arith.addf %80, %86 : vector<32x128xf32>
    %c31_i32_40 = arith.constant 31 : i32
    %88 = tpu.dynamic_rotate %77 by %c31_i32_40 dim 0 : vector<32x128xf32>, i32 -> vector<32x128xf32>
    %89 = vector.broadcast %24 : vector<32x1xf32> to vector<32x128xf32>
    %90 = arith.mulf %89, %88 : vector<32x128xf32>
    %c2_41 = arith.constant 2 : index
    %c0_42 = arith.constant 0 : index
    %c0_43 = arith.constant 0 : index
    %91 = vector.load %arg4[%c2_41, %c0_42, %c0_43] : memref<3x128x128xf32, #tpu.memory_space<vmem>>, vector<1x128x128xf32>
    %92 = vector.shape_cast %91 : vector<1x128x128xf32> to vector<128x128xf32>
    %cst_44 = arith.constant dense<0.000000e+00> : vector<32x128xf32>
    %93 = tpu.matmul %90, %92, %cst_44 {dimension_numbers = #tpu.dot_dimension_numbers<[1], [0], [0], [1], [0, 0, 1, 1], [], []>} : vector<32x128xf32>, vector<128x128xf32>, vector<32x128xf32> -> vector<32x128xf32>
    %94 = arith.addf %87, %93 : vector<32x128xf32>
    %cst_45 = arith.constant dense<0.000000e+00> : vector<128xf32>
    %95 = vector.multi_reduction <add>, %94, %cst_45 [0] : vector<32x128xf32> to vector<128xf32>
    %96 = vector.shape_cast %95 : vector<128xf32> to vector<1x128xf32>
    %97 = arith.mulf %94, %94 : vector<32x128xf32>
    %cst_46 = arith.constant dense<0.000000e+00> : vector<128xf32>
    %98 = vector.multi_reduction <add>, %97, %cst_46 [0] : vector<32x128xf32> to vector<128xf32>
    %99 = vector.shape_cast %98 : vector<128xf32> to vector<1x128xf32>
    %100 = tpu.concatenate %96, %99 in 0 : vector<1x128xf32>, vector<1x128xf32> -> vector<2x128xf32>
    %c0_47 = arith.constant 0 : index
    %c0_48 = arith.constant 0 : index
    %101 = vector.load %arg7[%c0_47, %c0_48] : memref<128x8xf32, #tpu.memory_space<vmem>>, vector<128x8xf32>
    %cst_49 = arith.constant dense<0.000000e+00> : vector<2x8xf32>
    %102 = tpu.matmul %100, %101, %cst_49 {dimension_numbers = #tpu.dot_dimension_numbers<[1], [0], [0], [1], [0, 0, 1, 1], [], []>} : vector<2x128xf32>, vector<128x8xf32>, vector<2x8xf32> -> vector<2x8xf32>
    %cst_50 = arith.constant 0.001953125 : f32
    %103 = vector.broadcast %cst_50 : f32 to vector<2x8xf32>
    %104 = arith.mulf %102, %103 : vector<2x8xf32>
    %105 = vector.extract_strided_slice %104 {offsets = [0, 0], sizes = [1, 8], strides = [1, 1]} : vector<2x8xf32> to vector<1x8xf32>
    %106 = vector.extract_strided_slice %104 {offsets = [1, 0], sizes = [1, 8], strides = [1, 1]} : vector<2x8xf32> to vector<1x8xf32>
    %107 = arith.mulf %105, %105 : vector<1x8xf32>
    %108 = arith.subf %106, %107 : vector<1x8xf32>
    %cst_51 = arith.constant 0.000000e+00 : f32
    %109 = vector.broadcast %cst_51 : f32 to vector<1x8xf32>
    %110 = arith.maximumf %108, %109 : vector<1x8xf32>
    %c0_52 = arith.constant 0 : index
    %c0_53 = arith.constant 0 : index
    %111 = vector.load %arg5[%c0_52, %c0_53] : memref<1x8xf32, #tpu.memory_space<vmem>>, vector<1x8xf32>
    %cst_54 = arith.constant 9.99999974E-6 : f32
    %112 = vector.broadcast %cst_54 : f32 to vector<1x8xf32>
    %113 = arith.addf %110, %112 : vector<1x8xf32>
    %114 = math.rsqrt %113 : vector<1x8xf32>
    %115 = arith.mulf %111, %114 : vector<1x8xf32>
    %c0_55 = arith.constant 0 : index
    %c0_56 = arith.constant 0 : index
    %116 = vector.load %arg6[%c0_55, %c0_56] : memref<1x8xf32, #tpu.memory_space<vmem>>, vector<1x8xf32>
    %117 = arith.mulf %105, %115 : vector<1x8xf32>
    %118 = arith.subf %116, %117 : vector<1x8xf32>
    %119 = tpu.concatenate %115, %118 in 0 : vector<1x8xf32>, vector<1x8xf32> -> vector<2x8xf32>
    %c0_57 = arith.constant 0 : index
    %c0_58 = arith.constant 0 : index
    %120 = vector.load %arg8[%c0_57, %c0_58] : memref<8x128xf32, #tpu.memory_space<vmem>>, vector<8x128xf32>
    %cst_59 = arith.constant dense<0.000000e+00> : vector<2x128xf32>
    %121 = tpu.matmul %119, %120, %cst_59 {dimension_numbers = #tpu.dot_dimension_numbers<[1], [0], [0], [1], [0, 0, 1, 1], [], []>} : vector<2x8xf32>, vector<8x128xf32>, vector<2x128xf32> -> vector<2x128xf32>
    %122 = vector.extract_strided_slice %121 {offsets = [0, 0], sizes = [1, 128], strides = [1, 1]} : vector<2x128xf32> to vector<1x128xf32>
    %123 = vector.broadcast %122 : vector<1x128xf32> to vector<32x128xf32>
    %124 = arith.mulf %94, %123 : vector<32x128xf32>
    %125 = vector.extract_strided_slice %121 {offsets = [1, 0], sizes = [1, 128], strides = [1, 1]} : vector<2x128xf32> to vector<1x128xf32>
    %126 = vector.broadcast %125 : vector<1x128xf32> to vector<32x128xf32>
    %127 = arith.addf %124, %126 : vector<32x128xf32>
    %cst_60 = arith.constant 0.000000e+00 : f32
    %128 = vector.broadcast %cst_60 : f32 to vector<32x128xf32>
    %129 = arith.maximumf %127, %128 : vector<32x128xf32>
    %c0_61 = arith.constant 0 : index
    %c0_62 = arith.constant 0 : index
    %130 = vector.load %arg9[%c0_61, %c0_62] : memref<32x128xf32, #tpu.memory_space<vmem>>, vector<32x128xf32>
    tpu.vector_store %arg9[%c0_61, %c0_62], %129 {strides = array<i32>} : memref<32x128xf32, #tpu.memory_space<vmem>>, vector<32x128xf32>,
    return
  }
}

</mosaic_0001>

<bundles_post_ra>
// kernel: tpu_custom_call.1
= control target key start
LH: loop header
LB: loop body
LE: loop exit
PB: predicated region body
PF: predicated region fallthrough
CT: control target
= control target key end

     0   :  { %14 = vsyncpa [#allocation3], 0  ;;  %s1179_s0 = inlined_call_operand.vmem [shape: f32[32,128], index: 0, kind: input, shape index: {}]   ;;  %s1180_s1 = inlined_call_operand.hbm [shape: f32[3,128,128], index: 1, kind: input, shape index: {}]   ;;  %s1181_s2 = inlined_call_operand.vmem [shape: f32[1,8], index: 2, kind: input, shape index: {}]   ;;  %s1182_s3 = inlined_call_operand.vmem [shape: f32[1,8], index: 3, kind: input, shape index: {}]   ;;  %s1183_s4 = inlined_call_operand.hbm [shape: f32[3,128,128], index: 4, kind: input, shape index: {}]   ;;  %s1184_s5 = inlined_call_operand.vmem [shape: f32[1,8], index: 5, kind: input, shape index: {}]   ;;  %s1185_s6 = inlined_call_operand.vmem [shape: f32[1,8], index: 6, kind: input, shape index: {}]   ;;  %s1186_s7 = inlined_call_operand.vmem [shape: f32[128,8], index: 7, kind: input, shape index: {}]   ;;  %s1187_s8 = inlined_call_operand.vmem [shape: f32[8,128], index: 8, kind: input, shape index: {}]   ;;  %s1188_s9 = inlined_call_operand.hbm [shape: f32[32,128], index: 9, kind: output, shape index: {}]  }
   0x1   :  { %15 = vsyncpa [#allocation6], 0 }
   0x2   :  { %16 = vsyncpa [#allocation4], 0  ;;  %s23_s11 = sshll.u32 %s1180_s1, 4  ;;  %s839_s12 = smov [#allocation2]   ;;  %s24_s11 = int_to_ptr.hbm [resolvable:$true] %s23_s11 }
   0x3   :  { %s25_s13 = sshll.u32 %s839_s12, 4  ;;  %s40_s16 = sshll.u32 %s1183_s4, 4  ;;  %s26_s13 = int_to_ptr.vmem [resolvable:$true] %s25_s13  ;;  %s41_s16 = int_to_ptr.hbm [resolvable:$true] %s40_s16 }
   0x4   :  { %s840_s17 = smov 128   ;;  %s841_s18 = smov 8  }
   0x5   :  { %31 = dma.hbm_to_vmem [thread:$0]  %s24_s11, 6144, %s26_s13, [#allocation3], %s840_s17, %s840_s17, %s841_s18  }
   0x6   :  { %s842_s19 = smov [#allocation5]  }
   0x7   :  { %s42_s20 = sshll.u32 %s842_s19, 4  ;;  %s43_s20 = int_to_ptr.vmem [resolvable:$true] %s42_s20 }
   0x8   :  { %48 = dma.hbm_to_vmem [thread:$0]  %s41_s16, 6144, %s43_s20, [#allocation6], %s840_s17, %s840_s17, %s841_s18  }
   0x9   :  { %833 = dma.done.wait [#allocation3], 6144  }
   0xa   :  { %834 = vsyncadd [#allocation3], 4294961152 }
   0xb   :  { %835 = dma.done.wait [#allocation6], 6144  }
   0xc   :  { %836 = vsyncadd [#allocation6], 4294961152  ;;  %v279_v0 = vld [vmem:[#allocation2 + $0x178] sm:$0xff]  ;;  %v278_v1 = vld [vmem:[#allocation2 + $0x170] sm:$0xff]  ;;  %v65_v21 = vlaneseq  ;;  %v843_v55 = vmov 0.0   ;;  %vm335_vm6 = vcmask 1040384  }
   0xd   :  { %v191_v2 = vld [vmem:[#allocation2 + $0x78] sm:$0xff]  ;;  %280 = vmatpush.msra.mxu2 %v279_v0  ;;  %v190_v4 = vld [vmem:[#allocation2 + $0x70] sm:$0xff]  ;;  %v277_v5 = vld [vmem:[#allocation2 + $0x168] sm:$0xff]  ;;  %vm406_vm10 = vcmask 64512   ;;  %s731_s23 = sshll.u32 %s1188_s9, 4  ;;  %s732_s23 = int_to_ptr.hbm [resolvable:$true] %s731_s23 }
   0xe   :  { %192 = vmatpush.msra.mxu0 %v191_v2  ;;  %v162_v3 = vld [vmem:[#allocation2 + $0xf8] sm:$0xff]  ;;  %v161_v6 = vld [vmem:[#allocation2 + $0xf0] sm:$0xff]  ;;  %v189_v7 = vld [vmem:[#allocation2 + $0x68] sm:$0xff]  ;;  %v907_v28 = vshrl.u32 %v65_v21, 7 }
   0xf   :  { %221 = vmatpush.msra.mxu1 %v162_v3  ;;  %281 = vmatpush.msra.mxu2 %v278_v1  ;;  %v160_v8 = vld [vmem:[#allocation2 + $0xe8] sm:$0xff]  ;;  %v276_v9 = vld [vmem:[#allocation2 + $0x160] sm:$0xff]  ;;  %v275_v12 = vld [vmem:[#allocation2 + $0x158] sm:$0xff] }
  0x10   :  { %193 = vmatpush.msra.mxu0 %v190_v4  ;;  %v188_v10 = vld [vmem:[#allocation2 + $0x60] sm:$0xff]  ;;  %v187_v13 = vld [vmem:[#allocation2 + $0x58] sm:$0xff]  ;;  %v274_v15 = vld [vmem:[#allocation2 + $0x150] sm:$0xff]  ;;  %v74_v35 = vand.u32 15, %v907_v28  ;;  %v67_v46 = vadd.s32 8, %v907_v28  ;;  %vm167_vm1 = vcmp.lt.s32.totalorder %v907_v28, 1 }
  0x11   :  { %222 = vmatpush.msra.mxu1 %v161_v6  ;;  %282 = vmatpush.msra.mxu2 %v277_v5  ;;  %v159_v11 = vld [vmem:[#allocation2 + $0xe0] sm:$0xff]  ;;  %v158_v14 = vld [vmem:[#allocation2 + $0xd8] sm:$0xff]  ;;  %v186_v16 = vld [vmem:[#allocation2 + $0x50] sm:$0xff]  ;;  %vm254_vm2 = vcmp.lt.s32.totalorder %v907_v28, 7  ;;  %v68_v3 = vadd.s32 16, %v907_v28 }
  0x12   :  { %194 = vmatpush.msra.mxu0 %v189_v7  ;;  %v157_v17 = vld [vmem:[#allocation2 + $0xd0] sm:$0xff]  ;;  %v273_v18 = vld [vmem:[#allocation2 + $0x148] sm:$0xff]  ;;  %v272_v22 = vld [vmem:[#allocation2 + $0x140] sm:$0xff]  ;;  %vm118_vm0 = vcmp.gt.s32.totalorder %v74_v35, 0  ;;  %v81_v58 = vand.u32 15, %v67_v46 }
  0x13   :  { %223 = vmatpush.msra.mxu1 %v160_v8  ;;  %283 = vmatpush.msra.mxu2 %v276_v9  ;;  %v185_v19 = vld [vmem:[#allocation2 + $0x48] sm:$0xff]  ;;  %v184_v23 = vld [vmem:[#allocation2 + $0x40] sm:$0xff]  ;;  %v271_v25 = vld [vmem:[#allocation2 + $0x138] sm:$0xff]  ;;  %v932_v56 = vsel %vm118_vm0, 1.0, %v843_v55  ;;  %v88_v7 = vand.u32 15, %v68_v3 }
  0x14   :  { %195 = vmatpush.msra.mxu0 %v188_v10  ;;  %v156_v20 = vld [vmem:[#allocation2 + $0xc8] sm:$0xff]  ;;  %v155_v24 = vld [vmem:[#allocation2 + $0xc0] sm:$0xff]  ;;  %v183_v26 = vld [vmem:[#allocation2 + $0x38] sm:$0xff]  ;;  %vm131_vm3 = vcmp.lt.s32.totalorder %v81_v58, 15 }
  0x15   :  { %224 = vmatpush.msra.mxu1 %v159_v11  ;;  %284 = vmatpush.msra.mxu2 %v275_v12  ;;  %v154_v27 = vld [vmem:[#allocation2 + $0xb8] sm:$0xff]  ;;  %v270_v29 = vld [vmem:[#allocation2 + $0x130] sm:$0xff]  ;;  %v269_v32 = vld [vmem:[#allocation2 + $0x128] sm:$0xff]  ;;  %v946_v4 = vsel %vm131_vm3, 1.0, %v843_v55  ;;  %v69_v11 = vadd.s32 24, %v907_v28  ;;  %vm120_vm4 = vcmp.gt.s32.totalorder %v88_v7, 0 }
  0x16   :  { %196 = vmatpush.msra.mxu0 %v187_v13  ;;  %v182_v30 = vld [vmem:[#allocation2 + $0x30] sm:$0xff]  ;;  %v181_v33 = vld [vmem:[#allocation2 + $0x28] sm:$0xff]  ;;  %v268_v37 = vld [vmem:[#allocation2 + $0x120] sm:$0xff]  ;;  %v957_v13 = vsel %vm120_vm4, 1.0, %v843_v55 }
  0x17   :  { %225 = vmatpush.msra.mxu1 %v158_v14  ;;  %285 = vmatpush.msra.mxu2 %v274_v15  ;;  %v153_v31 = vld [vmem:[#allocation2 + $0xb0] sm:$0xff]  ;;  %v152_v34 = vld [vmem:[#allocation2 + $0xa8] sm:$0xff]  ;;  %v180_v38 = vld [vmem:[#allocation2 + $0x20] sm:$0xff]  ;;  %v95_v15 = vand.u32 15, %v69_v11 }
  0x18   :  { %197 = vmatpush.msra.mxu0 %v186_v16  ;;  %v913_v36 = vld [vmem:[%s1179_s0 + $0x18] sm:$0xff]  ;;  %v151_v39 = vld [vmem:[#allocation2 + $0xa0] sm:$0xff]  ;;  %v918_v40 = vld [vmem:[%s1179_s0] sm:$0xff] }
  0x19   :  { %226 = vmatpush.msra.mxu1 %v157_v17  ;;  %286 = vmatpush.msra.mxu2 %v273_v18  ;;  %v267_v41 = vld [vmem:[#allocation2 + $0x118] sm:$0xff]  ;;  %v923_v43 = vld [vmem:[%s1179_s0 + $0x8] sm:$0xff]  ;;  %v163_v44 = vrot.slane %v918_v40, 7  ;;  %v166_v45 = vrot.slane %v913_v36, 7  ;;  %v266_v48 = vld [vmem:[#allocation2 + $0x110] sm:$0xff]  ;;  %v250_v51 = vrot.slane %v918_v40, 1 }
  0x1a   :  { %198 = vmatpush.msra.mxu0 %v185_v19  ;;  %v179_v42 = vld [vmem:[#allocation2 + $0x18] sm:$0xff]  ;;  %v178_v49 = vld [vmem:[#allocation2 + $0x10] sm:$0xff]  ;;  %v251_v52 = vrot.slane %v923_v43, 1  ;;  %v265_v53 = vld [vmem:[#allocation2 + $0x108] sm:$0xff]  ;;  %v164_v6 = vrot.slane %v923_v43, 7  ;;  %v253_v12 = vrot.slane %v913_v36, 1 }
  0x1b   :  { %227 = vmatpush.msra.mxu1 %v156_v20  ;;  %287 = vmatpush.msra.mxu2 %v272_v22  ;;  %v150_v47 = vld [vmem:[#allocation2 + $0x98] sm:$0xff]  ;;  %v149_v50 = vld [vmem:[#allocation2 + $0x90] sm:$0xff]  ;;  %v177_v54 = vld [vmem:[#allocation2 + $0x8] sm:$0xff]  ;;  %v171_v57 = vsel %vm167_vm1, %v166_v45, %v163_v44  ;;  %vm133_vm5 = vcmp.lt.s32.totalorder %v95_v15, 15 }
  0x1c   :  { %199 = vmatpush.msra.mxu0 %v184_v23  ;;  %v144_v59 = vld [vmem:[%s1179_s0 + $0x10] sm:$0xff]  ;;  %v264_v61 = vld [vmem:[#allocation2 + $0x100] sm:$0xff]  ;;  %v257_v63 = vsel %vm254_vm2, %v250_v51, %v251_v52  ;;  %v172_v1 = vmul.f32 %v932_v56, %v171_v57  ;;  %v170_v9 = vsel %vm167_vm1, %v163_v44, %v164_v6  ;;  %v964_v18 = vsel %vm133_vm5, 1.0, %v843_v55  ;;  %v977_v22 = vld [vmem:[%s1186_s7 + $0x78] sm:$0xff] }
  0x1d   :  { %228 = vmatpush.msra.mxu1 %v155_v24  ;;  %288 = vmatpush.msra.mxu2 %v271_v25  ;;  %v148_v60 = vld [vmem:[#allocation2 + $0x88] sm:$0xff]  ;;  %v176_v62 = vld [vmem:[#allocation2] sm:$0xff]  ;;  %v252_v2 = vrot.slane %v144_v59, 1  ;;  %v165_v10 = vrot.slane %v144_v59, 7  ;;  %v258_v19 = vsel %vm254_vm2, %v253_v12, %v250_v51  ;;  %v995_v25 = vld [vmem:[%s1186_s7 + $0x60] sm:$0xff] }
  0x1e   :  { %200 = vmatpush.msra.mxu0 %v183_v26  ;;  %v147_v0 = vld [vmem:[#allocation2 + $0x80] sm:$0xff]  ;;  %v262_v20 = vmul.f32 %v964_v18, %v258_v19  ;;  %353 = vmatpush.msra.mxu3 %v977_v22  ;;  %v983_v23 = vld [vmem:[%s1186_s7 + $0x70] sm:$0xff]  ;;  %v1001_v26 = vld [vmem:[%s1186_s7 + $0x58] sm:$0xff] }
  0x1f   :  { %229 = vmatpush.msra.mxu1 %v154_v27  ;;  %289 = vmatpush.msra.mxu2 %v270_v29  ;;  %v256_v5 = vsel %vm254_vm2, %v251_v52, %v252_v2  ;;  %v169_v14 = vsel %vm167_vm1, %v164_v6, %v165_v10  ;;  %v255_v16 = vsel %vm254_vm2, %v252_v2, %v253_v12  ;;  %v989_v24 = vld [vmem:[%s1186_s7 + $0x68] sm:$0xff]  ;;  %v1007_v27 = vld [vmem:[%s1186_s7 + $0x50] sm:$0xff]  ;;  %v1066_v44 = vld [vmem:[%s1186_s7] sm:$0xff] }
  0x20   :  { %201 = vmatpush.msra.mxu0 %v182_v30  ;;  %v260_v8 = vmul.f32 %v946_v4, %v256_v5  ;;  %v174_v17 = vmul.f32 %v957_v13, %v169_v14  ;;  %v168_v21 = vsel %vm167_vm1, %v165_v10, %v166_v45  ;;  %354 = vmatpush.msra.mxu3 %v983_v23  ;;  %v1013_v29 = vld [vmem:[%s1186_s7 + $0x48] sm:$0xff]  ;;  %v1019_v30 = vld [vmem:[%s1186_s7 + $0x40] sm:$0xff] }
  0x21   :  { %230 = vmatpush.msra.mxu1 %v153_v31  ;;  %290 = vmatpush.msra.mxu2 %v269_v32  ;;  %v1037_v35 = vld [vmem:[%s1186_s7 + $0x28] sm:$0xff] }
  0x22   :  { %202 = vmatpush.msra.mxu0 %v181_v33  ;;  %355 = vmatpush.msra.mxu3 %v989_v24  ;;  %v1025_v33 = vld [vmem:[%s1186_s7 + $0x38] sm:$0xff] }
  0x23   :  { %231 = vmatpush.msra.mxu1 %v152_v34  ;;  %291 = vmatpush.msra.mxu2 %v268_v37  ;;  %v1031_v34 = vld [vmem:[%s1186_s7 + $0x30] sm:$0xff]  ;;  %v1042_v37 = vld [vmem:[%s1186_s7 + $0x20] sm:$0xff] }
  0x24   :  { %203 = vmatpush.msra.mxu0 %v180_v38  ;;  %356 = vmatpush.msra.mxu3 %v995_v25  ;;  %v1048_v38 = vld [vmem:[%s1186_s7 + $0x18] sm:$0xff] }
  0x25   :  { %232 = vmatpush.msra.mxu1 %v151_v39  ;;  %292 = vmatpush.msra.mxu2 %v267_v41  ;;  %v1054_v41 = vld [vmem:[%s1186_s7 + $0x10] sm:$0xff] }
  0x26   :  { %204 = vmatpush.msra.mxu0 %v179_v42  ;;  %357 = vmatpush.msra.mxu3 %v1001_v26  ;;  %v1060_v42 = vld [vmem:[%s1186_s7 + $0x8] sm:$0xff] }
  0x27   :  { %233 = vmatpush.msra.mxu1 %v150_v47  ;;  %293 = vmatpush.msra.mxu2 %v266_v48 }
  0x28   :  { %205 = vmatpush.msra.mxu0 %v178_v49  ;;  %358 = vmatpush.msra.mxu3 %v1007_v27 }
  0x29   :  { %234 = vmatpush.msra.mxu1 %v149_v50  ;;  %294 = vmatpush.msra.mxu2 %v265_v53 }
  0x2a   :  { %206 = vmatpush.msra.mxu0 %v177_v54  ;;  %359 = vmatpush.msra.mxu3 %v1013_v29 }
  0x2b   :  { %235 = vmatpush.msra.mxu1 %v148_v60  ;;  %295 = vmatpush.msra.mxu2 %v264_v61 }
  0x2c   :  { %207 = vmatpush.msra.mxu0 %v176_v62  ;;  %296 = vmatmul.f32.vlgmr.msra.gmra.mxu2 %v257_v63 }
  0x2d   :  { %236 = vmatpush.msra.mxu1 %v147_v0  ;;  %208 = vmatmul.f32.vlgmr.msra.gmra.mxu0 %v172_v1 }
  0x2e   :  { %237 = vmatmul.f32.vlgmr.msra.gmra.mxu1 %v918_v40  ;;  %360 = vmatpush.msra.mxu3 %v1019_v30 }
  0x30   :  { %361 = vmatpush.msra.mxu3 %v1025_v33 }
  0x32   :  { %362 = vmatpush.msra.mxu3 %v1031_v34 }
  0x34   :  { %299 = vmatmul.f32.gmra.mxu2 %v260_v8  ;;  %363 = vmatpush.msra.mxu3 %v1037_v35 }
  0x35   :  { %211 = vmatmul.f32.gmra.mxu0 %v170_v9 }
  0x36   :  { %240 = vmatmul.f32.gmra.mxu1 %v923_v43  ;;  %364 = vmatpush.msra.mxu3 %v1042_v37 }
  0x38   :  { %365 = vmatpush.msra.mxu3 %v1048_v38 }
  0x3a   :  { %366 = vmatpush.msra.mxu3 %v1054_v41 }
  0x3c   :  { %302 = vmatmul.f32.gmra.mxu2 %v255_v16  ;;  %367 = vmatpush.msra.mxu3 %v1060_v42 }
  0x3d   :  { %214 = vmatmul.f32.gmra.mxu0 %v174_v17 }
  0x3e   :  { %243 = vmatmul.f32.gmra.mxu1 %v144_v59  ;;  %368 = vmatpush.msra.mxu3 %v1066_v44 }
  0x44   :  { %305 = vmatmul.f32.gmra.mxu2 %v262_v20 }
  0x45   :  { %217 = vmatmul.f32.gmra.mxu0 %v168_v21 }
  0x46   :  { %246 = vmatmul.f32.gmra.mxu1 %v913_v36 }
  0xaa   :  { %v209_v31 = vpop.f32.mrf.mxu0 }
  0xab   :  { %v238_v32 = vpop.f32.mrf.mxu1 }
  0xac   :  { %v239_v48 = vadd.f32 %v238_v32, %v209_v31 }
  0xaf   :  { %v297_v36 = vpop.f32.mrf.mxu2 }
  0xb0   :  { %v1072_v52 = vadd.f32 %v297_v36, %v239_v48  ;;  %v459_v48 = vld [vmem:[#allocation5 + $0xf0] sm:$0xff] }
  0xb2   :  { %v212_v39 = vpop.f32.mrf.mxu0  ;;  %v322_v59 = vmul.f32 %v1072_v52, %v1072_v52 }
  0xb3   :  { %v241_v40 = vpop.f32.mrf.mxu1 }
  0xb4   :  { %v242_v47 = vadd.f32 %v241_v40, %v212_v39 }
  0xb7   :  { %v300_v43 = vpop.f32.mrf.mxu2 }
  0xb8   :  { %v1070_v51 = vadd.f32 %v300_v43, %v242_v47  ;;  %v460_v47 = vld [vmem:[#allocation5 + $0xf8] sm:$0xff] }
  0xb9   :  { %518 = vmatpush.msrb.mxu1 %v460_v47  ;;  %v446_v47 = vld [vmem:[#allocation5 + $0x88] sm:$0xff] }
  0xba   :  { %v215_v45 = vpop.f32.mrf.mxu0  ;;  %v323_v57 = vmul.f32 %v1070_v51, %v1070_v51  ;;  %v313_v60 = vadd.f32 %v1070_v51, %v1072_v52 }
  0xbb   :  { %v244_v46 = vpop.f32.mrf.mxu1  ;;  %519 = vmatpush.msrb.mxu1 %v459_v48  ;;  %v476_v48 = vld [vmem:[#allocation5 + $0x18] sm:$0xff] }
  0xbc   :  { %v245_v49 = vadd.f32 %v244_v46, %v215_v45  ;;  %v326_v63 = vadd.f32 %v323_v57, %v322_v59  ;;  %v1099_v46 = vld [vmem:[%s1187_s8] sm:$0xff]  ;;  %v573_v57 = vld [vmem:[#allocation5 + $0x168] sm:$0xff] }
  0xbd   :  { %425 = vmatpush.msrb.mxu3 %v1099_v46 }
  0xbf   :  { %v303_v50 = vpop.f32.mrf.mxu2 }
  0xc0   :  { %v1074_v53 = vadd.f32 %v303_v50, %v245_v49  ;;  %v575_v49 = vld [vmem:[#allocation5 + $0x178] sm:$0xff]  ;;  %v574_v50 = vld [vmem:[#allocation5 + $0x170] sm:$0xff] }
  0xc1   :  { %576 = vmatpush.msrb.mxu2 %v575_v49  ;;  %v445_v49 = vld [vmem:[#allocation5 + $0x80] sm:$0xff] }
  0xc2   :  { %v218_v54 = vpop.f32.mrf.mxu0  ;;  %v324_v61 = vmul.f32 %v1074_v53, %v1074_v53  ;;  %v314_v0 = vadd.f32 %v313_v60, %v1074_v53  ;;  %v486_v60 = vld [vmem:[#allocation5 + $0x68] sm:$0xff] }
  0xc3   :  { %v247_v55 = vpop.f32.mrf.mxu1  ;;  %577 = vmatpush.msrb.mxu2 %v574_v50  ;;  %v561_v50 = vld [vmem:[#allocation5 + $0x108] sm:$0xff] }
  0xc4   :  { %v248_v58 = vadd.f32 %v247_v55, %v218_v54  ;;  %v327_v2 = vadd.f32 %v326_v63, %v324_v61  ;;  %v488_v54 = vld [vmem:[#allocation5 + $0x78] sm:$0xff]  ;;  %v458_v55 = vld [vmem:[#allocation5 + $0xe8] sm:$0xff]  ;;  %v485_v63 = vld [vmem:[#allocation5 + $0x60] sm:$0xff] }
  0xc5   :  { %489 = vmatpush.msrb.mxu0 %v488_v54  ;;  %520 = vmatpush.msrb.mxu1 %v458_v55  ;;  %v475_v54 = vld [vmem:[#allocation5 + $0x10] sm:$0xff]  ;;  %v560_v55 = vld [vmem:[#allocation5 + $0x100] sm:$0xff] }
  0xc6   :  { %578 = vmatpush.msrb.mxu2 %v573_v57  ;;  %v474_v57 = vld [vmem:[#allocation5 + $0x8] sm:$0xff] }
  0xc7   :  { %v306_v62 = vpop.f32.mrf.mxu2 }
  0xc8   :  { %v1085_v1 = vadd.f32 %v306_v62, %v248_v58  ;;  %v487_v58 = vld [vmem:[#allocation5 + $0x70] sm:$0xff]  ;;  %v457_v62 = vld [vmem:[#allocation5 + $0xe0] sm:$0xff] }
  0xc9   :  { %490 = vmatpush.msrb.mxu0 %v487_v58  ;;  %521 = vmatpush.msrb.mxu1 %v457_v62  ;;  %v473_v58 = vld [vmem:[#allocation5] sm:$0xff] }
  0xca   :  { %v315_v3 = vadd.f32 %v314_v0, %v1085_v1  ;;  %v325_v5 = vmul.f32 %v1085_v1, %v1085_v1 }
  0xcb   :  { %491 = vmatpush.msrb.mxu0 %v486_v60 }
  0xcc   :  { %v316_v6 = vrot.slane %v315_v3, 4  ;;  %v328_v7 = vadd.f32 %v327_v2, %v325_v5  ;;  %v456_v2 = vld [vmem:[#allocation5 + $0xd8] sm:$0xff] }
  0xcd   :  { %492 = vmatpush.msrb.mxu0 %v485_v63  ;;  %522 = vmatpush.msrb.mxu1 %v456_v2 }
  0xce   :  { %v317_v8 = vadd.f32 %v316_v6, %v315_v3  ;;  %v329_v9 = vrot.slane %v328_v7, 4  ;;  %v571_v3 = vld [vmem:[#allocation5 + $0x158] sm:$0xff]  ;;  %v455_v6 = vld [vmem:[#allocation5 + $0xd0] sm:$0xff] }
  0xcf   :  { %523 = vmatpush.msrb.mxu1 %v455_v6 }
  0xd0   :  { %v318_v10 = vrot.slane %v317_v8, 2  ;;  %v330_v11 = vadd.f32 %v329_v9, %v328_v7  ;;  %v570_v7 = vld [vmem:[#allocation5 + $0x150] sm:$0xff]  ;;  %v454_v9 = vld [vmem:[#allocation5 + $0xc8] sm:$0xff] }
  0xd1   :  { %524 = vmatpush.msrb.mxu1 %v454_v9 }
  0xd2   :  { %v319_v12 = vadd.f32 %v318_v10, %v317_v8  ;;  %v331_v14 = vrot.slane %v330_v11, 2  ;;  %v569_v10 = vld [vmem:[#allocation5 + $0x148] sm:$0xff] }
  0xd4   :  { %v320_v15 = vrot.slane %v319_v12, 1  ;;  %v332_v16 = vadd.f32 %v331_v14, %v330_v11  ;;  %v568_v14 = vld [vmem:[#allocation5 + $0x140] sm:$0xff] }
  0xd6   :  { %v333_v17 = vrot.slane %v332_v16, 1  ;;  %v321_v19 = vadd.f32 %v320_v15, %v319_v12  ;;  %v453_v12 = vld [vmem:[#allocation5 + $0xc0] sm:$0xff] }
  0xd7   :  { %525 = vmatpush.msrb.mxu1 %v453_v12 }
  0xd8   :  { %v334_v20 = vadd.f32 %v333_v17, %v332_v16  ;;  %v452_v16 = vld [vmem:[#allocation5 + $0xb8] sm:$0xff] }
  0xd9   :  { %v567_v17 = vld [vmem:[#allocation5 + $0x138] sm:$0xff]  ;;  %526 = vmatpush.msrb.mxu1 %v452_v16 }
  0xda   :  { %v336_v21 = vsel %vm335_vm6, %v321_v19, %v334_v20  ;;  %v451_v19 = vld [vmem:[#allocation5 + $0xb0] sm:$0xff] }
  0xdb   :  { %369 = vmatmul.f32.vlgmr.msra.gmra.mxu3 %v336_v21  ;;  %v566_v20 = vld [vmem:[#allocation5 + $0x130] sm:$0xff]  ;;  %527 = vmatpush.msrb.mxu1 %v451_v19 }
  0xdc   :  { %632 = vmatpush.msra.mxu3 %v977_v22  ;;  %v572_v22 = vld [vmem:[#allocation5 + $0x160] sm:$0xff] }
  0xdd   :  { %579 = vmatpush.msrb.mxu2 %v572_v22 }
  0xde   :  { %633 = vmatpush.msra.mxu3 %v983_v23  ;;  %v484_v23 = vld [vmem:[#allocation5 + $0x58] sm:$0xff] }
  0xdf   :  { %580 = vmatpush.msrb.mxu2 %v571_v3  ;;  %493 = vmatpush.msrb.mxu0 %v484_v23 }
  0xe0   :  { %634 = vmatpush.msra.mxu3 %v989_v24  ;;  %v483_v24 = vld [vmem:[#allocation5 + $0x50] sm:$0xff] }
  0xe1   :  { %581 = vmatpush.msrb.mxu2 %v570_v7  ;;  %494 = vmatpush.msrb.mxu0 %v483_v24 }
  0xe2   :  { %635 = vmatpush.msra.mxu3 %v995_v25  ;;  %v482_v25 = vld [vmem:[#allocation5 + $0x48] sm:$0xff] }
  0xe3   :  { %582 = vmatpush.msrb.mxu2 %v569_v10  ;;  %495 = vmatpush.msrb.mxu0 %v482_v25 }
  0xe4   :  { %636 = vmatpush.msra.mxu3 %v1001_v26  ;;  %v481_v26 = vld [vmem:[#allocation5 + $0x40] sm:$0xff] }
  0xe5   :  { %583 = vmatpush.msrb.mxu2 %v568_v14  ;;  %496 = vmatpush.msrb.mxu0 %v481_v26 }
  0xe6   :  { %637 = vmatpush.msra.mxu3 %v1007_v27  ;;  %v480_v27 = vld [vmem:[#allocation5 + $0x38] sm:$0xff] }
  0xe7   :  { %584 = vmatpush.msrb.mxu2 %v567_v17  ;;  %497 = vmatpush.msrb.mxu0 %v480_v27 }
  0xe8   :  { %638 = vmatpush.msra.mxu3 %v1013_v29  ;;  %v450_v29 = vld [vmem:[#allocation5 + $0xa8] sm:$0xff] }
  0xe9   :  { %585 = vmatpush.msrb.mxu2 %v566_v20  ;;  %528 = vmatpush.msrb.mxu1 %v450_v29 }
  0xea   :  { %639 = vmatpush.msra.mxu3 %v1019_v30  ;;  %v380_v30 = vld [vmem:[%s1181_s2] sm:$0x1] }
  0xec   :  { %640 = vmatpush.msra.mxu3 %v1025_v33  ;;  %v398_v33 = vld [vmem:[%s1182_s3] sm:$0x1] }
  0xee   :  { %641 = vmatpush.msra.mxu3 %v1031_v34 }
  0xf0   :  { %642 = vmatpush.msra.mxu3 %v1037_v35 }
  0xf2   :  { %643 = vmatpush.msra.mxu3 %v1042_v37  ;;  %v449_v37 = vld [vmem:[#allocation5 + $0xa0] sm:$0xff] }
  0xf3   :  { %529 = vmatpush.msrb.mxu1 %v449_v37 }
  0xf4   :  { %644 = vmatpush.msra.mxu3 %v1048_v38  ;;  %v565_v38 = vld [vmem:[#allocation5 + $0x128] sm:$0xff] }
  0xf5   :  { %586 = vmatpush.msrb.mxu2 %v565_v38 }
  0xf6   :  { %645 = vmatpush.msra.mxu3 %v1054_v41  ;;  %v448_v41 = vld [vmem:[#allocation5 + $0x98] sm:$0xff] }
  0xf7   :  { %530 = vmatpush.msrb.mxu1 %v448_v41 }
  0xf8   :  { %646 = vmatpush.msra.mxu3 %v1060_v42  ;;  %v478_v42 = vld [vmem:[#allocation5 + $0x28] sm:$0xff] }
  0xfa   :  { %647 = vmatpush.msra.mxu3 %v1066_v44  ;;  %v563_v44 = vld [vmem:[#allocation5 + $0x118] sm:$0xff] }
 0x15e   :  { %v370_v31 = vpop.f32.mrf.mxu3 }
 0x15f   :  { %v1091_v32 = vmul.f32 0.001953125, %v370_v31 }
 0x161   :  { %v374_v36 = vmul.f32 %v1091_v32, %v1091_v32 }
 0x163   :  { %v376_v39 = vrot.slane %v374_v36, 7 }
 0x165   :  { %v378_v40 = vsub.f32 %v1091_v32, %v376_v39 }
 0x167   :  { %v379_v43 = vmax.f32 %v378_v40, 0.0  ;;  %v479_v40 = vld [vmem:[#allocation5 + $0x30] sm:$0xff] }
 0x168   :  { %498 = vmatpush.msrb.mxu0 %v479_v40 }
 0x169   :  { %v381_v45 = vadd.f32 1e-05, %v379_v43  ;;  %v447_v43 = vld [vmem:[#allocation5 + $0x90] sm:$0xff] }
 0x16a   :  { %499 = vmatpush.msrb.mxu0 %v478_v42  ;;  %531 = vmatpush.msrb.mxu1 %v447_v43 }
 0x16b   :  { %757 = vrsqrt.f32 %v381_v45  ;;  %vm388_vm8 = vweird.f32 %v381_v45 }
 0x16c   :  { %532 = vmatpush.msrb.mxu1 %v446_v47 }
 0x16e   :  { %533 = vmatpush.msrb.mxu1 %v445_v49 }
 0x171   :  { %v758_v59 = vpop.eup %757 }
 0x172   :  { %v383_v61 = vmul.f32 %v758_v59, %v381_v45  ;;  %vm389_vm7 = vweird.f32 %v758_v59  ;;  %v477_v45 = vld [vmem:[#allocation5 + $0x20] sm:$0xff] }
 0x173   :  { %vm390_vm9 = vmor %vm388_vm8, %vm389_vm7  ;;  %500 = vmatpush.msrb.mxu0 %v477_v45 }
 0x174   :  { %v384_v0 = vmul.f32 %v758_v59, %v383_v61 }
 0x175   :  { %501 = vmatpush.msrb.mxu0 %v476_v48 }
 0x176   :  { %v385_v5 = vmul.f32 0.5, %v384_v0 }
 0x177   :  { %502 = vmatpush.msrb.mxu0 %v475_v54 }
 0x178   :  { %v386_v8 = vsub.f32 1.5, %v385_v5 }
 0x179   :  { %503 = vmatpush.msrb.mxu0 %v474_v57 }
 0x17a   :  { %v387_v11 = vmul.f32 %v758_v59, %v386_v8 }
 0x17b   :  { %504 = vmatpush.msrb.mxu0 %v473_v58 }
 0x17c   :  { %v391_v15 = vsel %vm390_vm9, %v758_v59, %v387_v11 }
 0x17d   :  { %393 = vst [vmem:[#allocation1] sm:$0xff] %v391_v15 }
 0x184   :  { %v395_v21 = vld [vmem:[#allocation1 + $0x1] ss:$9 sm:$0xff] }
 0x185   :  { %v397_v31 = vmul.f32 %v395_v21, %v380_v30 }
 0x187   :  { %v399_v34 = vmul.f32 %v397_v31, %v1091_v32  ;;  %v564_v32 = vld [vmem:[#allocation5 + $0x120] sm:$0xff] }
 0x188   :  { %587 = vmatpush.msrb.mxu2 %v564_v32 }
 0x189   :  { %v400_v36 = vsub.f32 %v398_v33, %v399_v34 }
 0x18a   :  { %588 = vmatpush.msrb.mxu2 %v563_v44 }
 0x18b   :  { %v402_v39 = vperm.slane %v400_v36, 0 }
 0x18d   :  { %v404_v35 = vsel %vm335_vm6, %v397_v31, %v402_v39 }
 0x18e   :  { %749 = vmatmul.msk.f32.vlgmr.msrb.gmra.mxu3 %vm406_vm10, %v404_v35 }
 0x18f   :  { %702 = vmatpush.msrb.mxu3 %v1099_v46  ;;  %v562_v46 = vld [vmem:[#allocation5 + $0x110] sm:$0xff] }
 0x190   :  { %589 = vmatpush.msrb.mxu2 %v562_v46 }
 0x192   :  { %590 = vmatpush.msrb.mxu2 %v561_v50 }
 0x194   :  { %591 = vmatpush.msrb.mxu2 %v560_v55 }
 0x211   :  { %v427_v59 = vpop.f32.mrf.mxu3 }
 0x212   :  { %v430_v60 = vperm.slane %v427_v59, 0  ;;  %v435_v61 = vperm.slane %v427_v59, 1 }
 0x214   :  { %v432_v62 = vmul.f32 %v430_v60, %v1070_v51  ;;  %v433_v22 = vmul.f32 %v430_v60, %v1074_v53  ;;  %v434_v63 = vmul.f32 %v430_v60, %v1085_v1  ;;  %v431_v0 = vmul.f32 %v430_v60, %v1072_v52 }
 0x216   :  { %v437_v2 = vadd.f32 %v435_v61, %v432_v62  ;;  %v438_v3 = vadd.f32 %v435_v61, %v433_v22  ;;  %v439_v23 = vadd.f32 %v435_v61, %v434_v63  ;;  %v436_v5 = vadd.f32 %v435_v61, %v431_v0 }
 0x218   :  { %v441_v6 = vmax.f32 %v437_v2, 0.0  ;;  %v442_v7 = vmax.f32 %v438_v3, 0.0  ;;  %v443_v24 = vmax.f32 %v439_v23, 0.0  ;;  %v440_v8 = vmax.f32 %v436_v5, 0.0 }
 0x21a   :  { %v461_v9 = vrot.slane %v440_v8, 7  ;;  %534 = vmatmul.f32.vlgmr.msrb.gmra.mxu1 %v440_v8  ;;  %v547_v10 = vrot.slane %v440_v8, 1  ;;  %v548_v25 = vrot.slane %v441_v6, 1  ;;  %v464_v11 = vrot.slane %v443_v24, 7 }
 0x21b   :  { %v549_v52 = vrot.slane %v442_v7, 1  ;;  %v462_v14 = vrot.slane %v441_v6, 7  ;;  %v463_v16 = vrot.slane %v442_v7, 7  ;;  %v550_v17 = vrot.slane %v443_v24, 1 }
 0x21c   :  { %v553_v51 = vsel %vm254_vm2, %v547_v10, %v548_v25  ;;  %v468_v53 = vsel %vm167_vm1, %v464_v11, %v461_v9 }
 0x21d   :  { %592 = vmatmul.f32.vlgmr.msrb.gmra.mxu2 %v553_v51  ;;  %v469_v1 = vmul.f32 %v932_v56, %v468_v53  ;;  %v552_v12 = vsel %vm254_vm2, %v548_v25, %v549_v52  ;;  %v467_v15 = vsel %vm167_vm1, %v461_v9, %v462_v14  ;;  %v466_v27 = vsel %vm167_vm1, %v462_v14, %v463_v16 }
 0x21e   :  { %v556_v26 = vmul.f32 %v946_v4, %v552_v12  ;;  %v551_v56 = vsel %vm254_vm2, %v549_v52, %v550_v17  ;;  %v471_v19 = vmul.f32 %v957_v13, %v466_v27  ;;  %v554_v4 = vsel %vm254_vm2, %v550_v17, %v547_v10  ;;  %v659_v17 = vld [vmem:[%s1184_s5] sm:$0x1]  ;;  %s844_s5 = smov [#allocation7]  }
 0x21f   :  { %505 = vmatmul.f32.vlgmr.msrb.gmra.mxu0 %v469_v1  ;;  %v558_v20 = vmul.f32 %v964_v18, %v554_v4  ;;  %v465_v29 = vsel %vm167_vm1, %v463_v16, %v464_v11 }
 0x222   :  { %537 = vmatmul.f32.gmra.mxu1 %v441_v6 }
 0x225   :  { %595 = vmatmul.f32.gmra.mxu2 %v556_v26 }
 0x227   :  { %508 = vmatmul.f32.gmra.mxu0 %v467_v15 }
 0x22a   :  { %540 = vmatmul.f32.gmra.mxu1 %v442_v7 }
 0x22d   :  { %598 = vmatmul.f32.gmra.mxu2 %v551_v56 }
 0x22f   :  { %511 = vmatmul.f32.gmra.mxu0 %v471_v19  ;;  %v677_v19 = vld [vmem:[%s1185_s6] sm:$0x1]  ;;  %s729_s6 = sshll.u32 %s844_s5, 4  ;;  %s730_s6 = int_to_ptr.vmem [resolvable:$true] %s729_s6 }
 0x232   :  { %543 = vmatmul.f32.gmra.mxu1 %v443_v24 }
 0x235   :  { %601 = vmatmul.f32.gmra.mxu2 %v558_v20 }
 0x237   :  { %514 = vmatmul.f32.gmra.mxu0 %v465_v29 }
 0x297   :  { %v535_v30 = vpop.f32.mrf.mxu1 }
 0x29c   :  { %v506_v21 = vpop.f32.mrf.mxu0 }
 0x29d   :  { %v536_v38 = vadd.f32 %v535_v30, %v506_v21 }
 0x29f   :  { %v538_v33 = vpop.f32.mrf.mxu1 }
 0x2a0   :  { %v593_v31 = vpop.f32.mrf.mxu2 }
 0x2a1   :  { %v605_v18 = vadd.f32 %v593_v31, %v536_v38 }
 0x2a3   :  { %v618_v44 = vmul.f32 %v605_v18, %v605_v18 }
 0x2a4   :  { %v509_v34 = vpop.f32.mrf.mxu0 }
 0x2a5   :  { %v539_v35 = vadd.f32 %v538_v33, %v509_v34 }
 0x2a7   :  { %v541_v39 = vpop.f32.mrf.mxu1 }
 0x2a8   :  { %v596_v36 = vpop.f32.mrf.mxu2 }
 0x2a9   :  { %v1152_v40 = vadd.f32 %v596_v36, %v539_v35 }
 0x2ab   :  { %v619_v42 = vmul.f32 %v1152_v40, %v1152_v40  ;;  %v609_v45 = vadd.f32 %v1152_v40, %v605_v18 }
 0x2ac   :  { %v512_v13 = vpop.f32.mrf.mxu0 }
 0x2ad   :  { %v542_v41 = vadd.f32 %v541_v39, %v512_v13  ;;  %v622_v49 = vadd.f32 %v619_v42, %v618_v44 }
 0x2af   :  { %v544_v43 = vpop.f32.mrf.mxu1 }
 0x2b0   :  { %v599_v37 = vpop.f32.mrf.mxu2 }
 0x2b1   :  { %v1154_v32 = vadd.f32 %v599_v37, %v542_v41 }
 0x2b3   :  { %v620_v47 = vmul.f32 %v1154_v32, %v1154_v32  ;;  %v610_v50 = vadd.f32 %v609_v45, %v1154_v32 }
 0x2b4   :  { %v515_v28 = vpop.f32.mrf.mxu0 }
 0x2b5   :  { %v545_v46 = vadd.f32 %v544_v43, %v515_v28  ;;  %v623_v55 = vadd.f32 %v622_v49, %v620_v47 }
 0x2b8   :  { %v602_v48 = vpop.f32.mrf.mxu2 }
 0x2b9   :  { %v608_v54 = vadd.f32 %v602_v48, %v545_v46 }
 0x2bb   :  { %v611_v57 = vadd.f32 %v610_v50, %v608_v54  ;;  %v621_v58 = vmul.f32 %v608_v54, %v608_v54 }
 0x2bd   :  { %v612_v59 = vrot.slane %v611_v57, 4  ;;  %v624_v60 = vadd.f32 %v623_v55, %v621_v58 }
 0x2bf   :  { %v613_v61 = vadd.f32 %v612_v59, %v611_v57  ;;  %v625_v62 = vrot.slane %v624_v60, 4 }
 0x2c1   :  { %v614_v22 = vrot.slane %v613_v61, 2  ;;  %v626_v63 = vadd.f32 %v625_v62, %v624_v60 }
 0x2c3   :  { %v615_v0 = vadd.f32 %v614_v22, %v613_v61  ;;  %v627_v2 = vrot.slane %v626_v63, 2 }
 0x2c5   :  { %v616_v3 = vrot.slane %v615_v0, 1  ;;  %v628_v23 = vadd.f32 %v627_v2, %v626_v63 }
 0x2c7   :  { %v629_v5 = vrot.slane %v628_v23, 1  ;;  %v617_v6 = vadd.f32 %v616_v3, %v615_v0 }
 0x2c9   :  { %v630_v7 = vadd.f32 %v629_v5, %v628_v23 }
 0x2cb   :  { %v631_v24 = vsel %vm335_vm6, %v617_v6, %v630_v7 }
 0x2cc   :  { %648 = vmatmul.f32.vlgmr.msra.gmra.mxu3 %v631_v24 }
 0x34f   :  { %v649_v8 = vpop.f32.mrf.mxu3 }
 0x350   :  { %v652_v9 = vmul.f32 0.001953125, %v649_v8 }
 0x352   :  { %v653_v10 = vmul.f32 %v652_v9, %v652_v9 }
 0x354   :  { %v655_v25 = vrot.slane %v653_v10, 7 }
 0x356   :  { %v657_v11 = vsub.f32 %v652_v9, %v655_v25 }
 0x358   :  { %v658_v51 = vmax.f32 %v657_v11, 0.0 }
 0x35a   :  { %v660_v53 = vadd.f32 1e-05, %v658_v51 }
 0x35c   :  { %759 = vrsqrt.f32 %v660_v53  ;;  %vm667_vm12 = vweird.f32 %v660_v53 }
 0x362   :  { %v760_v52 = vpop.eup %759 }
 0x363   :  { %v662_v1 = vmul.f32 %v760_v52, %v660_v53  ;;  %vm668_vm11 = vweird.f32 %v760_v52 }
 0x364   :  { %vm669_vm13 = vmor %vm667_vm12, %vm668_vm11 }
 0x365   :  { %v663_v12 = vmul.f32 %v760_v52, %v662_v1 }
 0x367   :  { %v664_v14 = vmul.f32 0.5, %v663_v12 }
 0x369   :  { %v665_v26 = vsub.f32 1.5, %v664_v14 }
 0x36b   :  { %v666_v15 = vmul.f32 %v760_v52, %v665_v26 }
 0x36d   :  { %v670_v16 = vsel %vm669_vm13, %v760_v52, %v666_v15 }
 0x36e   :  { %672 = vst [vmem:[#allocation1] sm:$0xff] %v670_v16 }
 0x375   :  { %v674_v27 = vld [vmem:[#allocation1 + $0x1] ss:$9 sm:$0xff] }
 0x376   :  { %v676_v56 = vmul.f32 %v674_v27, %v659_v17 }
 0x378   :  { %v678_v4 = vmul.f32 %v676_v56, %v652_v9 }
 0x37a   :  { %v679_v20 = vsub.f32 %v677_v19, %v678_v4 }
 0x37c   :  { %v681_v29 = vperm.slane %v679_v20, 0 }
 0x37e   :  { %v683_v30 = vsel %vm335_vm6, %v676_v56, %v681_v29 }
 0x37f   :  { %750 = vmatmul.msk.f32.vlgmr.msrb.gmra.mxu3 %vm406_vm10, %v683_v30 }
 0x402   :  { %v704_v21 = vpop.f32.mrf.mxu3 }
 0x403   :  { %v707_v31 = vperm.slane %v704_v21, 0  ;;  %v712_v33 = vperm.slane %v704_v21, 1 }
 0x405   :  { %v708_v34 = vmul.f32 %v707_v31, %v605_v18  ;;  %v709_v36 = vmul.f32 %v707_v31, %v1152_v40  ;;  %v710_v39 = vmul.f32 %v707_v31, %v1154_v32  ;;  %v711_v13 = vmul.f32 %v707_v31, %v608_v54 }
 0x407   :  { %v713_v35 = vadd.f32 %v712_v33, %v708_v34  ;;  %v714_v37 = vadd.f32 %v712_v33, %v709_v36  ;;  %v715_v38 = vadd.f32 %v712_v33, %v710_v39  ;;  %v716_v41 = vadd.f32 %v712_v33, %v711_v13 }
 0x409   :  { %v717_v28 = vmax.f32 %v713_v35, 0.0  ;;  %v718_v42 = vmax.f32 %v714_v37, 0.0  ;;  %v719_v43 = vmax.f32 %v715_v38, 0.0  ;;  %v720_v44 = vmax.f32 %v716_v41, 0.0 }
 0x40b   :  { %721 = vst [vmem:[#allocation7] sm:$0xff] %v717_v28 }
 0x40c   :  { %722 = vst [vmem:[#allocation7 + $0x8] sm:$0xff] %v718_v42 }
 0x40d   :  { %723 = vst [vmem:[#allocation7 + $0x10] sm:$0xff] %v719_v43 }
 0x40e   :  { %724 = vst [vmem:[#allocation7 + $0x18] sm:$0xff] %v720_v44 }
 0x40f   :  { %737 = dma.vmem_to_hbm [thread:$0]  %s730_s6, 512, %s732_s23, [#allocation4], %s840_s17, %s840_s17, %s841_s18  }
 0x410   :  { %837 = dma.done.wait [#allocation4], 512  }
 0x411   :  { %838 = vsyncadd [#allocation4], 4294966784 }
 0x412   :  { %742 = vsyncpa [#allocation3], 1 }
 0x413   :  { %743 = vsyncpa [#allocation6], 1 }
 0x414   :  { %744 = vsyncpa [#allocation4], 1 }

</bundles_post_ra>
